<compile_context>
chip_gen: v5e
topology: v5e:2x2
jax: 0.10.0
libtpu: 0.0.40
codegen_flags: <defaults>
</compile_context>

<pallas_src>
import jax
import jax.numpy as jnp
from jax import lax
from jax.experimental import pallas as pl
from jax.experimental.pallas import tpu as pltpu


_LANE = 128
_VMEM_TILE_BUDGET = 40 * 1024 * 1024   # working-set budget used to pick tiles
_VMEM_LIMIT_CAP = 56 * 1024 * 1024     # stays under v7x's 64 MiB physical VMEM


def _round_up(x, m):
    return (x + m - 1) // m * m


def _make_sa_kernel(C, n_valid, n_padded, fuse_proj, mxu_dtype):
    """Flash-style SA_Block kernel body. Grid = (B, nq, nk), kv axis last."""
    needs_mask = n_padded > n_valid

    def kernel(*args):
        if fuse_proj:
            (xq_ref, xkv_ref, wq_ref, bq_ref, wvk_ref, bvk_ref,
             o_ref, q_scr, m_scr, l_scr, acc_scr) = args
        else:
            (xq_ref, kv_ref, wq_ref, bq_ref,
             o_ref, q_scr, m_scr, l_scr, acc_scr) = args

        ki = pl.program_id(2)

        @pl.when(ki == 0)
        def _init():
            # Query projection (1x1x1 conv == channel matmul), hoisted out of
            # the kv loop; kept f32 for the online-softmax statistics.
            q_scr[...] = (jnp.dot(wq_ref[...], xq_ref[0],
                                  preferred_element_type=jnp.float32)
                          + bq_ref[...])                           # (C8p, TQ)
            m_scr[...] = jnp.full(m_scr.shape, -jnp.inf, m_scr.dtype)
            l_scr[...] = jnp.zeros(l_scr.shape, l_scr.dtype)
            acc_scr[...] = jnp.zeros(acc_scr.shape, acc_scr.dtype)

        if fuse_proj:
            # Small-C path: fused, gamma-folded V/K projection of this kv tile.
            vk = (jnp.dot(wvk_ref[...], xkv_ref[0],
                          preferred_element_type=jnp.float32)
                  + bvk_ref[...])                                  # (C + C8p, TK)
            v_blk = vk[:C].astype(mxu_dtype)
            k_blk = vk[C:].astype(mxu_dtype)
        else:
            # Large-C path: [gamma*V ; K] precomputed once per batch in the
            # wrapper (already stored in mxu_dtype).
            kv = kv_ref[0]                                         # (C + C8p, TK)
            v_blk = kv[:C]
            k_blk = kv[C:]

        # energy^T for this block: s_t[nk, nq] = sum_c k[c, nk] * q[c, nq].
        # Queries live on lanes so the softmax stats and the accumulator
        # broadcast over sublanes with no transposes; bf16 operands, f32 acc.
        s_t = lax.dot_general(k_blk, q_scr[...].astype(mxu_dtype),
                              (((0,), (0,)), ((), ())),
                              preferred_element_type=jnp.float32)  # (TK, TQ)

        m_prev = m_scr[...]                                        # (1, TQ)
        m_new = jnp.maximum(m_prev, jnp.max(s_t, axis=0, keepdims=True))
        alpha = jnp.exp(m_prev - m_new)                            # (1, TQ)
        p = jnp.exp(s_t - m_new)                                   # (TK, TQ)

        if needs_mask:
            # N was padded up to a lane multiple: zero out padded keys so they
            # contribute to neither the denominator nor the PV accumulation.
            key_idx = ki * s_t.shape[0] + lax.broadcasted_iota(
                jnp.int32, s_t.shape, 0)
            p = jnp.where(key_idx < n_valid, p, 0.0)

        l_scr[...] = alpha * l_scr[...] + jnp.sum(p, axis=0, keepdims=True)
        acc_scr[...] = alpha * acc_scr[...] + jnp.dot(
            v_blk, p.astype(mxu_dtype), preferred_element_type=jnp.float32)
        m_scr[...] = m_new

        @pl.when(ki == pl.num_programs(2) - 1)
        def _finalize():
            # Normalize once per query tile (per-query reciprocal, not an NxN
            # divide), add the residual, lane-dense store of the (C, TQ) slab.
            inv_l = pl.reciprocal(l_scr[...], approx=False)        # (1, TQ)
            o_ref[0] = (acc_scr[...] * inv_l + xq_ref[0]).astype(o_ref.dtype)

    return kernel


def _vmem_bytes(C, c8p, ckv, kv_itemsize, tq, tk, fuse_proj):
    """Rough per-step VMEM working set (double-buffered blocks + scratch)."""
    b = 2 * C * tq * 4               # xq blocks (double-buffered)
    b += 2 * ckv * tk * kv_itemsize  # kv-side blocks
    b += 2 * C * tq * 4              # output blocks
    w = c8p * (C + 1) * 4            # Wq + bq
    if fuse_proj:
        w += (C + c8p) * (C + 1) * 4  # [gamma*Wv ; Wk] + bias
    b += 2 * w
    b += (c8p + C + 2) * tq * 4      # q / m / l / acc scratch
    b += 3 * tk * tq * 4             # s_t, p & friends (f32 intermediates)
    b += 2 << 20                     # headroom
    return b


def _pick_tiles(np_, B, C, c8p, ckv, kv_itemsize, fuse_proj, tq, tk):
    cand = [t for t in (2048, 1024, 512, 256, 128) if np_ % t == 0] or [np_]
    if tq is None:
        tq_cands = [t for t in cand if t <= 512] or [cand[-1]]
        if B == 1:  # v7x megacore: keep B*nq >= 2 when the problem allows it
            mc = [t for t in tq_cands if np_ // t >= 2]
            if mc:
                tq_cands = mc
    else:
        tq_cands = [tq]
    tk_cands = cand if tk is None else [tk]
    # tk-first: prefer a large kv tile (fewer inner grid steps, no accumulator
    # growth) and shrink the query tile only if the VMEM budget demands it.
    for tk_sel in tk_cands:
        for tq_sel in tq_cands:
            if (_vmem_bytes(C, c8p, ckv, kv_itemsize, tq_sel, tk_sel, fuse_proj)
                    <= _VMEM_TILE_BUDGET):
                return tq_sel, tk_sel
    return tq_cands[-1], tk_cands[-1]


def sa_block(x, params, *, tq=None, tk=None, mxu_dtype=jnp.bfloat16,
             fuse_projection=None):
    """x: (B, C, H, W, L) float32 -> (B, C, H, W, L). SA_Block forward."""
    B, C, H, W, L = x.shape
    N = H * W * L
    wq, bq, wk, bk, wv, bv, gamma = params
    C8 = wq.shape[0]

    # Pad the Q/K head dim to a full sublane tile; zero rows contribute exactly
    # zero to the energy so numerics are unchanged, but the contraction is a
    # dense MXU matmul even for small C.
    C8p = max(8, _round_up(C8, 8))
    wq_p = jnp.zeros((C8p, C), jnp.float32).at[:C8].set(wq)
    bq_p = jnp.zeros((C8p,), jnp.float32).at[:C8].set(bq)
    wk_p = jnp.zeros((C8p, C), jnp.float32).at[:C8].set(wk)
    bk_p = jnp.zeros((C8p,), jnp.float32).at[:C8].set(bk)
    g = gamma.reshape(())

    # Channel-major layout, spatial axis on lanes; pad N up to a lane multiple
    # so every load/store is lane-dense (padded keys are masked in-kernel,
    # padded query rows are sliced away below).
    Np = _round_up(N, _LANE)
    xf = x.reshape(B, C, N)
    if Np != N:
        xf = jnp.pad(xf, ((0, 0), (0, 0), (0, Np - N)))

    if fuse_projection is None:
        fuse_projection = C < 64

    hp = lax.Precision.HIGHEST
    if fuse_projection:
        # Small C: fuse the V and K projections into one in-kernel matmul on
        # the raw x tile (V first so both slices sit on sublane boundaries).
        ckv = C
        kv_itemsize = 4
        wvk = jnp.concatenate([g * wv, wk_p], axis=0)                      # (C+C8p, C)
        bvk = jnp.concatenate([g * bv, bk_p], axis=0).reshape(C + C8p, 1)
        kv_in = xf
    else:
        # Large C: hoist the K/V projection out of the (nq x nk) loop; compute
        # [gamma*V ; K] once per batch and stream it in mxu_dtype.
        ckv = C + C8p
        kv_itemsize = jnp.dtype(mxu_dtype).itemsize
        vproj = g * (jnp.einsum('oc,bcn->bon', wv, xf, precision=hp)
                     + bv[None, :, None])
        kproj = (jnp.einsum('oc,bcn->bon', wk_p, xf, precision=hp)
                 + bk_p[None, :, None])
        kv_in = jnp.concatenate([vproj, kproj], axis=1).astype(mxu_dtype)  # (B, C+C8p, Np)

    tq, tk = _pick_tiles(Np, B, C, C8p, ckv, kv_itemsize, fuse_projection, tq, tk)
    if Np % tq or Np % tk:
        raise ValueError(f"tq={tq} / tk={tk} must divide padded N={Np}")
    nq, nk = Np // tq, Np // tk

    in_specs = [
        pl.BlockSpec((1, C, tq), lambda b, qi, ki: (b, 0, qi)),    # x (query tile / residual)
        pl.BlockSpec((1, ckv, tk), lambda b, qi, ki: (b, 0, ki)),  # kv-side tile
        pl.BlockSpec((C8p, C), lambda b, qi, ki: (0, 0)),          # Wq (padded)
        pl.BlockSpec((C8p, 1), lambda b, qi, ki: (0, 0)),          # bq (padded)
    ]
    args = [xf, kv_in, wq_p, bq_p.reshape(C8p, 1)]
    if fuse_projection:
        in_specs += [
            pl.BlockSpec((C + C8p, C), lambda b, qi, ki: (0, 0)),  # [gamma*Wv ; Wk]
            pl.BlockSpec((C + C8p, 1), lambda b, qi, ki: (0, 0)),  # [gamma*bv ; bk]
        ]
        args += [wvk, bvk]

    vmem_limit = int(min(
        max(_vmem_bytes(C, C8p, ckv, kv_itemsize, tq, tk, fuse_projection)
            + (4 << 20), 16 << 20),
        _VMEM_LIMIT_CAP))

    kernel = _make_sa_kernel(C, N, Np, fuse_projection, mxu_dtype)

    out = pl.pallas_call(
        kernel,
        out_shape=jax.ShapeDtypeStruct((B, C, Np), x.dtype),
        grid_spec=pltpu.PrefetchScalarGridSpec(
            num_scalar_prefetch=0,
            grid=(B, nq, nk),
            in_specs=in_specs,
            out_specs=pl.BlockSpec((1, C, tq), lambda b, qi, ki: (b, 0, qi)),
            scratch_shapes=[
                pltpu.VMEM((C8p, tq), jnp.float32),   # q tile
                pltpu.VMEM((1, tq), jnp.float32),     # running max
                pltpu.VMEM((1, tq), jnp.float32),     # running sum
                pltpu.VMEM((C, tq), jnp.float32),     # unnormalized accumulator
            ],
        ),
        compiler_params=pltpu.CompilerParams(
            dimension_semantics=("parallel", "parallel", "arbitrary"),
            vmem_limit_bytes=vmem_limit),
    )(*args)

    if Np != N:
        out = out[:, :, :N]
    return out.reshape(B, C, H, W, L)


def reference_sa_block(x, params):
    """Pure-JAX reference mirroring the PyTorch forward exactly (f32 math)."""
    wq, bq, wk, bk, wv, bv, gamma = params
    B, C, H, W, L = x.shape
    N = H * W * L
    hp = lax.Precision.HIGHEST
    xf = x.reshape(B, C, N)
    q = jnp.einsum('oc,bcn->bon', wq, xf, precision=hp) + bq[None, :, None]
    k = jnp.einsum('oc,bcn->bon', wk, xf, precision=hp) + bk[None, :, None]
    v = jnp.einsum('oc,bcn->bon', wv, xf, precision=hp) + bv[None, :, None]
    energy = jnp.einsum('bcn,bcm->bnm', q, k, precision=hp)         # (B, N, N)
    att = jax.nn.softmax(energy, axis=-1)
    out = jnp.einsum('bcm,bnm->bcn', v, att, precision=hp)          # (B, C, N)
    return gamma[0] * out.reshape(B, C, H, W, L) + x


def make_params(key, C):
    C8 = C // 8
    ks = jax.random.split(key, 6)
    scale = 0.1
    wq = scale * jax.random.normal(ks[0], (C8, C), jnp.float32)
    bq = scale * jax.random.normal(ks[1], (C8,), jnp.float32)
    wk = scale * jax.random.normal(ks[2], (C8, C), jnp.float32)
    bk = scale * jax.random.normal(ks[3], (C8,), jnp.float32)
    wv = scale * jax.random.normal(ks[4], (C, C), jnp.float32)
    bv = scale * jax.random.normal(ks[5], (C,), jnp.float32)
    gamma = jnp.ones((1,), jnp.float32)
    return (wq, bq, wk, bk, wv, bv, gamma)


if __name__ == "__main__":
    def check(x, params, kwargs, tol, label):
        out = jax.block_until_ready(sa_block(x, params, **kwargs))
        ref = jax.block_until_ready(reference_sa_block(x, params))
        assert out.shape == x.shape, label
        err = float(jnp.max(jnp.abs(out - ref)))
        assert jnp.allclose(out, ref, atol=tol, rtol=tol), (label, err)

    key = jax.random.PRNGKey(0)
    k1, k2 = jax.random.split(key)

    # 1) Small fused-path case: C=16 (C//8=2 -> padded to 8 sublanes), N=64 ->
    #    padded to 128 lanes with masked keys.  f32-exact and bf16 MXU modes.
    x1 = jax.random.normal(k1, (2, 16, 4, 4, 4), jnp.float32)
    p1 = make_params(k2, 16)
    check(x1, p1, dict(mxu_dtype=jnp.float32), 5e-3, "small/f32")
    check(x1, p1, dict(), 8e-2, "small/bf16")

    # 2) Multi-tile online softmax: N=1024; forced (tq,tk)=(256,256) -> 4x4
    #    query/kv tiles, plus the auto-tiled default (tq=512, tk=1024, nq=2).
    x2 = jax.random.normal(jax.random.PRNGKey(1), (1, 16, 8, 8, 16), jnp.float32)
    p2 = make_params(jax.random.PRNGKey(2), 16)
    check(x2, p2, dict(tq=256, tk=256, mxu_dtype=jnp.float32), 5e-3, "multi/f32")
    check(x2, p2, dict(), 8e-2, "multi/bf16")

    # 3) Hoisted-projection path (C=64): N=192 padded to 256, tk=128 so only the
    #    last kv tile carries masked keys; grid (1, 2, 2).
    x3 = jax.random.normal(jax.random.PRNGKey(3), (1, 64, 4, 4, 12), jnp.float32)
    p3 = make_params(jax.random.PRNGKey(4), 64)
    check(x3, p3, dict(tk=128, mxu_dtype=jnp.float32), 5e-3, "hoist/f32")
    check(x3, p3, dict(tk=128), 8e-2, "hoist/bf16")

    print("KERNEL_OK")
</pallas_src>

<mosaic_0001>
module attributes {stable_mosaic.version = 11 : i64} {
  func.func @kernel(%arg0: i32, %arg1: i32, %arg2: i32, %arg3: memref<1x16x128xf32, #tpu.memory_space<vmem>>, %arg4: memref<1x16x128xf32, #tpu.memory_space<vmem>>, %arg5: memref<8x16xf32, #tpu.memory_space<vmem>>, %arg6: memref<8x1xf32, #tpu.memory_space<vmem>>, %arg7: memref<24x16xf32, #tpu.memory_space<vmem>>, %arg8: memref<24x1xf32, #tpu.memory_space<vmem>>, %arg9: memref<1x16x128xf32, #tpu.memory_space<vmem>>, %arg10: memref<8x128xf32, #tpu.memory_space<vmem>>, %arg11: memref<1x128xf32, #tpu.memory_space<vmem>>, %arg12: memref<1x128xf32, #tpu.memory_space<vmem>>, %arg13: memref<16x128xf32, #tpu.memory_space<vmem>>) attributes {dimension_semantics = [#tpu.dimension_semantics<parallel>, #tpu.dimension_semantics<parallel>, #tpu.dimension_semantics<arbitrary>], iteration_bounds = array<i64: 2, 1, 1>, scalar_prefetch = 0 : i64, scratch_operands = 4 : i64, tpu.core_type = #tpu.core_type<tc>, window_params = [{transform_indices = @transform_0, window_bounds = array<i64: 1, 16, 128>}, {transform_indices = @transform_1, window_bounds = array<i64: 1, 16, 128>}, {pipeline_mode = #tpu.pipeline_mode<synchronous>, transform_indices = @transform_2, window_bounds = array<i64: 8, 16>}, {pipeline_mode = #tpu.pipeline_mode<synchronous>, transform_indices = @transform_3, window_bounds = array<i64: 8, 1>}, {pipeline_mode = #tpu.pipeline_mode<synchronous>, transform_indices = @transform_4, window_bounds = array<i64: 24, 16>}, {pipeline_mode = #tpu.pipeline_mode<synchronous>, transform_indices = @transform_5, window_bounds = array<i64: 24, 1>}, {transform_indices = @transform_6, window_bounds = array<i64: 1, 16, 128>}]} {
    %c0_i32 = arith.constant 0 : i32
    %0 = arith.cmpi eq, %arg2, %c0_i32 : i32
    %1 = arith.extui %0 : i1 to i32
    %c0_i32_0 = arith.constant 0 : i32
    %2 = arith.cmpi ne, %1, %c0_i32_0 : i32
    scf.if %2 {
      %c0_28 = arith.constant 0 : index
      %c0_29 = arith.constant 0 : index
      %47 = vector.load %arg5[%c0_28, %c0_29] : memref<8x16xf32, #tpu.memory_space<vmem>>, vector<8x16xf32>
      %c0_30 = arith.constant 0 : index
      %c0_31 = arith.constant 0 : index
      %c0_32 = arith.constant 0 : index
      %48 = vector.load %arg3[%c0_30, %c0_31, %c0_32] : memref<1x16x128xf32, #tpu.memory_space<vmem>>, vector<1x16x128xf32>
      %49 = vector.shape_cast %48 : vector<1x16x128xf32> to vector<16x128xf32>
      %cst_33 = arith.constant dense<0.000000e+00> : vector<8x128xf32>
      %50 = tpu.matmul %47, %49, %cst_33 {dimension_numbers = #tpu.dot_dimension_numbers<[1], [0], [0], [1], [0, 0, 1, 1], [], []>} : vector<8x16xf32>, vector<16x128xf32>, vector<8x128xf32> -> vector<8x128xf32>
      %c0_34 = arith.constant 0 : index
      %c0_35 = arith.constant 0 : index
      %51 = vector.load %arg6[%c0_34, %c0_35] : memref<8x1xf32, #tpu.memory_space<vmem>>, vector<8x1xf32>
      %52 = vector.broadcast %51 : vector<8x1xf32> to vector<8x128xf32>
      %53 = arith.addf %50, %52 : vector<8x128xf32>
      %c0_36 = arith.constant 0 : index
      %c0_37 = arith.constant 0 : index
      %54 = vector.load %arg10[%c0_36, %c0_37] : memref<8x128xf32, #tpu.memory_space<vmem>>, vector<8x128xf32>
      tpu.vector_store %arg10[%c0_36, %c0_37], %53 {strides = array<i32>} : memref<8x128xf32, #tpu.memory_space<vmem>>, vector<8x128xf32>,
      %cst_38 = arith.constant 0xFF800000 : f32
      %55 = vector.broadcast %cst_38 : f32 to vector<1x128xf32>
      %c0_39 = arith.constant 0 : index
      %c0_40 = arith.constant 0 : index
      %56 = vector.load %arg11[%c0_39, %c0_40] : memref<1x128xf32, #tpu.memory_space<vmem>>, vector<1x128xf32>
      tpu.vector_store %arg11[%c0_39, %c0_40], %55 {strides = array<i32>} : memref<1x128xf32, #tpu.memory_space<vmem>>, vector<1x128xf32>,
      %cst_41 = arith.constant 0.000000e+00 : f32
      %57 = vector.broadcast %cst_41 : f32 to vector<1x128xf32>
      %c0_42 = arith.constant 0 : index
      %c0_43 = arith.constant 0 : index
      %58 = vector.load %arg12[%c0_42, %c0_43] : memref<1x128xf32, #tpu.memory_space<vmem>>, vector<1x128xf32>
      tpu.vector_store %arg12[%c0_42, %c0_43], %57 {strides = array<i32>} : memref<1x128xf32, #tpu.memory_space<vmem>>, vector<1x128xf32>,
      %cst_44 = arith.constant 0.000000e+00 : f32
      %59 = vector.broadcast %cst_44 : f32 to vector<16x128xf32>
      %c0_45 = arith.constant 0 : index
      %c0_46 = arith.constant 0 : index
      %60 = vector.load %arg13[%c0_45, %c0_46] : memref<16x128xf32, #tpu.memory_space<vmem>>, vector<16x128xf32>
      tpu.vector_store %arg13[%c0_45, %c0_46], %59 {strides = array<i32>} : memref<16x128xf32, #tpu.memory_space<vmem>>, vector<16x128xf32>,
    } else {
    }
    %c0 = arith.constant 0 : index
    %c0_1 = arith.constant 0 : index
    %3 = vector.load %arg7[%c0, %c0_1] : memref<24x16xf32, #tpu.memory_space<vmem>>, vector<24x16xf32>
    %c0_2 = arith.constant 0 : index
    %c0_3 = arith.constant 0 : index
    %c0_4 = arith.constant 0 : index
    %4 = vector.load %arg4[%c0_2, %c0_3, %c0_4] : memref<1x16x128xf32, #tpu.memory_space<vmem>>, vector<1x16x128xf32>
    %5 = vector.shape_cast %4 : vector<1x16x128xf32> to vector<16x128xf32>
    %cst = arith.constant dense<0.000000e+00> : vector<24x128xf32>
    %6 = tpu.matmul %3, %5, %cst {dimension_numbers = #tpu.dot_dimension_numbers<[1], [0], [0], [1], [0, 0, 1, 1], [], []>} : vector<24x16xf32>, vector<16x128xf32>, vector<24x128xf32> -> vector<24x128xf32>
    %c0_5 = arith.constant 0 : index
    %c0_6 = arith.constant 0 : index
    %7 = vector.load %arg8[%c0_5, %c0_6] : memref<24x1xf32, #tpu.memory_space<vmem>>, vector<24x1xf32>
    %8 = vector.broadcast %7 : vector<24x1xf32> to vector<24x128xf32>
    %9 = arith.addf %6, %8 : vector<24x128xf32>
    %10 = vector.extract_strided_slice %9 {offsets = [0, 0], sizes = [16, 128], strides = [1, 1]} : vector<24x128xf32> to vector<16x128xf32>
    %11 = vector.extract_strided_slice %9 {offsets = [16, 0], sizes = [8, 128], strides = [1, 1]} : vector<24x128xf32> to vector<8x128xf32>
    %c0_7 = arith.constant 0 : index
    %c0_8 = arith.constant 0 : index
    %12 = vector.load %arg10[%c0_7, %c0_8] : memref<8x128xf32, #tpu.memory_space<vmem>>, vector<8x128xf32>
    %cst_9 = arith.constant dense<0.000000e+00> : vector<128x128xf32>
    %13 = tpu.matmul %11, %12, %cst_9 {dimension_numbers = #tpu.dot_dimension_numbers<[0], [0], [1], [1], [0, 1, 1, 1], [], []>} : vector<8x128xf32>, vector<8x128xf32>, vector<128x128xf32> -> vector<128x128xf32>
    %c0_10 = arith.constant 0 : index
    %c0_11 = arith.constant 0 : index
    %14 = vector.load %arg11[%c0_10, %c0_11] : memref<1x128xf32, #tpu.memory_space<vmem>>, vector<1x128xf32>
    %cst_12 = arith.constant dense<0xFF800000> : vector<128xf32>
    %15 = vector.multi_reduction <maximumf>, %13, %cst_12 [0] : vector<128x128xf32> to vector<128xf32>
    %16 = vector.shape_cast %15 : vector<128xf32> to vector<1x128xf32>
    %17 = arith.maximumf %14, %16 : vector<1x128xf32>
    %18 = arith.subf %14, %17 : vector<1x128xf32>
    %19 = math.exp %18 : vector<1x128xf32>
    %20 = vector.broadcast %17 : vector<1x128xf32> to vector<128x128xf32>
    %21 = arith.subf %13, %20 : vector<128x128xf32>
    %22 = math.exp %21 : vector<128x128xf32>
    %c128_i32 = arith.constant 128 : i32
    %23 = arith.muli %arg2, %c128_i32 : i32
    %24 = tpu.iota {dimensions = array<i32: 0>} : vector<128x128xi32>
    %25 = vector.broadcast %23 : i32 to vector<128x128xi32>
    %26 = arith.addi %25, %24 : vector<128x128xi32>
    %c64_i32 = arith.constant 64 : i32
    %27 = vector.broadcast %c64_i32 : i32 to vector<128x128xi32>
    %28 = arith.cmpi slt, %26, %27 : vector<128x128xi32>
    %cst_13 = arith.constant 0.000000e+00 : f32
    %29 = vector.broadcast %cst_13 : f32 to vector<128x128xf32>
    %30 = arith.select %28, %22, %29 : vector<128x128xi1>, vector<128x128xf32>
    %c0_14 = arith.constant 0 : index
    %c0_15 = arith.constant 0 : index
    %31 = vector.load %arg12[%c0_14, %c0_15] : memref<1x128xf32, #tpu.memory_space<vmem>>, vector<1x128xf32>
    %32 = arith.mulf %19, %31 : vector<1x128xf32>
    %cst_16 = arith.constant dense<0.000000e+00> : vector<128xf32>
    %33 = vector.multi_reduction <add>, %30, %cst_16 [0] : vector<128x128xf32> to vector<128xf32>
    %34 = vector.shape_cast %33 : vector<128xf32> to vector<1x128xf32>
    %35 = arith.addf %32, %34 : vector<1x128xf32>
    %c0_17 = arith.constant 0 : index
    %c0_18 = arith.constant 0 : index
    %36 = vector.load %arg12[%c0_17, %c0_18] : memref<1x128xf32, #tpu.memory_space<vmem>>, vector<1x128xf32>
    tpu.vector_store %arg12[%c0_17, %c0_18], %35 {strides = array<i32>} : memref<1x128xf32, #tpu.memory_space<vmem>>, vector<1x128xf32>,
    %c0_19 = arith.constant 0 : index
    %c0_20 = arith.constant 0 : index
    %37 = vector.load %arg13[%c0_19, %c0_20] : memref<16x128xf32, #tpu.memory_space<vmem>>, vector<16x128xf32>
    %38 = vector.broadcast %19 : vector<1x128xf32> to vector<16x128xf32>
    %39 = arith.mulf %38, %37 : vector<16x128xf32>
    %cst_21 = arith.constant dense<0.000000e+00> : vector<16x128xf32>
    %40 = tpu.matmul %10, %30, %cst_21 {dimension_numbers = #tpu.dot_dimension_numbers<[1], [0], [0], [1], [0, 0, 1, 1], [], []>} : vector<16x128xf32>, vector<128x128xf32>, vector<16x128xf32> -> vector<16x128xf32>
    %41 = arith.addf %39, %40 : vector<16x128xf32>
    %c0_22 = arith.constant 0 : index
    %c0_23 = arith.constant 0 : index
    %42 = vector.load %arg13[%c0_22, %c0_23] : memref<16x128xf32, #tpu.memory_space<vmem>>, vector<16x128xf32>
    tpu.vector_store %arg13[%c0_22, %c0_23], %41 {strides = array<i32>} : memref<16x128xf32, #tpu.memory_space<vmem>>, vector<16x128xf32>,
    %c0_24 = arith.constant 0 : index
    %c0_25 = arith.constant 0 : index
    %43 = vector.load %arg11[%c0_24, %c0_25] : memref<1x128xf32, #tpu.memory_space<vmem>>, vector<1x128xf32>
    tpu.vector_store %arg11[%c0_24, %c0_25], %17 {strides = array<i32>} : memref<1x128xf32, #tpu.memory_space<vmem>>, vector<1x128xf32>,
    %c0_i32_26 = arith.constant 0 : i32
    %44 = arith.cmpi eq, %arg2, %c0_i32_26 : i32
    %45 = arith.extui %44 : i1 to i32
    %c0_i32_27 = arith.constant 0 : i32
    %46 = arith.cmpi ne, %45, %c0_i32_27 : i32
    scf.if %46 {
      %c0_28 = arith.constant 0 : index
      %c0_29 = arith.constant 0 : index
      %47 = vector.load %arg12[%c0_28, %c0_29] : memref<1x128xf32, #tpu.memory_space<vmem>>, vector<1x128xf32>
      %48 = tpu.reciprocal %47 : vector<1x128xf32> -> vector<1x128xf32>
      %c0_30 = arith.constant 0 : index
      %c0_31 = arith.constant 0 : index
      %49 = vector.load %arg13[%c0_30, %c0_31] : memref<16x128xf32, #tpu.memory_space<vmem>>, vector<16x128xf32>
      %50 = vector.broadcast %48 : vector<1x128xf32> to vector<16x128xf32>
      %51 = arith.mulf %49, %50 : vector<16x128xf32>
      %c0_32 = arith.constant 0 : index
      %c0_33 = arith.constant 0 : index
      %c0_34 = arith.constant 0 : index
      %52 = vector.load %arg3[%c0_32, %c0_33, %c0_34] : memref<1x16x128xf32, #tpu.memory_space<vmem>>, vector<1x16x128xf32>
      %53 = vector.shape_cast %52 : vector<1x16x128xf32> to vector<16x128xf32>
      %54 = arith.addf %51, %53 : vector<16x128xf32>
      %c0_35 = arith.constant 0 : index
      %c0_36 = arith.constant 0 : index
      %c0_37 = arith.constant 0 : index
      %55 = vector.load %arg9[%c0_35, %c0_36, %c0_37] : memref<1x16x128xf32, #tpu.memory_space<vmem>>, vector<1x16x128xf32>
      %56 = vector.shape_cast %55 : vector<1x16x128xf32> to vector<16x128xf32>
      %57 = vector.shape_cast %54 : vector<16x128xf32> to vector<1x16x128xf32>
      tpu.vector_store %arg9[%c0_35, %c0_36, %c0_37], %57 {strides = array<i32>} : memref<1x16x128xf32, #tpu.memory_space<vmem>>, vector<1x16x128xf32>,
    } else {
    }
    return
  }
  func.func @transform_0(%arg0: i32, %arg1: i32, %arg2: i32) -> (i32, i32, i32) {
    %c0_i32 = arith.constant 0 : i32
    %c0_i32_0 = arith.constant 0 : i32
    return %arg0, %c0_i32, %arg1 : i32, i32, i32
  }
  func.func @transform_1(%arg0: i32, %arg1: i32, %arg2: i32) -> (i32, i32, i32) {
    %c0_i32 = arith.constant 0 : i32
    %c0_i32_0 = arith.constant 0 : i32
    return %arg0, %c0_i32, %arg2 : i32, i32, i32
  }
  func.func @transform_2(%arg0: i32, %arg1: i32, %arg2: i32) -> (i32, i32) {
    %c0_i32 = arith.constant 0 : i32
    %c0_i32_0 = arith.constant 0 : i32
    %c0_i32_1 = arith.constant 0 : i32
    return %c0_i32, %c0_i32_0 : i32, i32
  }
  func.func @transform_3(%arg0: i32, %arg1: i32, %arg2: i32) -> (i32, i32) {
    %c0_i32 = arith.constant 0 : i32
    %c0_i32_0 = arith.constant 0 : i32
    %c0_i32_1 = arith.constant 0 : i32
    return %c0_i32, %c0_i32_0 : i32, i32
  }
  func.func @transform_4(%arg0: i32, %arg1: i32, %arg2: i32) -> (i32, i32) {
    %c0_i32 = arith.constant 0 : i32
    %c0_i32_0 = arith.constant 0 : i32
    %c0_i32_1 = arith.constant 0 : i32
    return %c0_i32, %c0_i32_0 : i32, i32
  }
  func.func @transform_5(%arg0: i32, %arg1: i32, %arg2: i32) -> (i32, i32) {
    %c0_i32 = arith.constant 0 : i32
    %c0_i32_0 = arith.constant 0 : i32
    %c0_i32_1 = arith.constant 0 : i32
    return %c0_i32, %c0_i32_0 : i32, i32
  }
  func.func @transform_6(%arg0: i32, %arg1: i32, %arg2: i32) -> (i32, i32, i32) {
    %c0_i32 = arith.constant 0 : i32
    %c0_i32_0 = arith.constant 0 : i32
    return %arg0, %c0_i32, %arg1 : i32, i32, i32
  }
}

</mosaic_0001>

<bundles_post_ra>
// kernel: tpu_custom_call.1
= control target key start
LH: loop header
LB: loop body
LE: loop exit
PB: predicated region body
PF: predicated region fallthrough
CT: control target
= control target key end

     0   :  { %11 = vsyncpa [#allocation7], 0  ;;  %s1313_s0 = inlined_call_operand.vmem [shape: f32[2,16,128], index: 0, kind: input, shape index: {}]   ;;  %s1314_s1 = inlined_call_operand.vmem [shape: f32[2,16,128], index: 1, kind: input, shape index: {}]   ;;  %s1315_s2 = inlined_call_operand.vmem [shape: f32[8,16], index: 2, kind: input, shape index: {}]   ;;  %s1316_s3 = inlined_call_operand.vmem [shape: f32[8,1], index: 3, kind: input, shape index: {}]   ;;  %s1317_s4 = inlined_call_operand.vmem [shape: f32[24,16], index: 4, kind: input, shape index: {}]   ;;  %s1318_s5 = inlined_call_operand.vmem [shape: f32[24,1], index: 5, kind: input, shape index: {}]   ;;  %s1319_s6 = inlined_call_operand.hbm [shape: f32[2,16,128], index: 6, kind: output, shape index: {}]  }
   0x1   :  { %13 = vsyncpa [#allocation7 + $0x1], 0  ;;  %s1155_s21 = smov 0   ;;  %s1157_s22 = smov 0  }
   0x2   :  { %s1159_s23 = smov 0   ;;  %s1161_s24 = smov 0  }
   0x3   :  { %s1163_s25 = smov 0   ;;  %s1165_s26 = smov 0  }
   0x4 LB: > { %s912_s27 = sadd.s32 4294967295, %s1113_s26   ;;  %s913_s28 = sadd.s32 4294967294, %s1113_s26   ;;  %s1113_s26 = sphi %s1165_s26, %s19_s26   ;;  %s1109_s25 = sphi %s1163_s25, %s1326_s25   ;;  %s1105_s24 = sphi %s1161_s24, %s1325_s24   ;;  %s1101_s23 = sphi %s1159_s23, %s1324_s23   ;;  %s1097_s22 = sphi %s1157_s22, %s1323_s22   ;;  %s1093_s21 = sphi %s1155_s21, %s1322_s21  }
   0x5   : > { %s38_s29 = sadd.s32 1, %s1109_s25  ;;  %s187_s30 = sadd.s32 1, %s1101_s23 }
   0x6   : > { %p40_p0 = scmp.ge.s32.totalorder %s38_s29, 2  ;;  %p197_p1 = scmp.ne.s32.totalorder %s1101_s23, %s1097_s22 }
   0x7   : > { %p198_p2 = scmp.eq.s32.totalorder %s912_s27, 1  ;;  %p203_p3 = scmp.ne.s32.totalorder %s1097_s22, %s1093_s21 }
   0x8   : > { %s1328_s29 = smov (%p40_p0, %s38_s29), 0  ;;  %p204_p5 = scmp.eq.s32.totalorder %s913_s28, 1 }
   0x9   : > { %p1195_p4 = por %p198_p2, %p197_p1  ;;  %s182_s8 = ssub.s32 %s1109_s25, %s1328_s29 }
   0xa   : > { %p916_p6 = scmp.ge.s32.totalorder %s1113_s26, 1  ;;  %p185_p7 = scmp.eq.s32.totalorder %s182_s8, 0 }
   0xb   : > { %p1202_p8 = por %p204_p5, %p203_p3  ;;  %p256_p9 = scmp.lt.s32.totalorder %s1113_s26, 3 }
   0xc   : > { %s1208_s10 = scalar_select %p185_p7, %s1101_s23, %s187_s30  }
   0xd   : > { %p257_p10 = pnand %p916_p6, %p256_p9 }
   0xe   : > { %p297_p11 = scmp.lt.s32.totalorder (!%p257_p10), %s1105_s24, 1  ;;  %s949_s30 = sshll.u32 (!%p257_p10), %s1105_s24, 4 }
   0xf   : > { %260 = sbr.rel (%p257_p10) target bundleno = 793 (0x319), region = 44  ;;  %s809_s13 = scalar_lea.hbm (!%p257_p10), %s1319_s6, %s949_s30 }
  0x14   : > { %v320_v0 = vld [vmem:[%s1316_s3] sm:$0xff]  ;;  %v1115_v1 = vmov 0   ;;  %v362_v2 = vld [vmem:[%s1318_s5 + $0x10] sm:$0xff]  ;;  %s298_s15 = scalar_select %p297_p11, %s1105_s24, 1  ;;  %v361_v3 = vld [vmem:[%s1318_s5 + $0x8] sm:$0xff]  ;;  %vm326_vm0 = vcmask 130048  }
  0x15   : > { %1013 = vset.pattern.permute.xlu1 %v1115_v1  ;;  %1012 = vset.pattern.permute.xlu0 %v1115_v1  ;;  %v355_v6 = vld [vmem:[%s1317_s4] sm:$0xff]  ;;  %v356_v8 = vld [vmem:[%s1317_s4 + $0x8] sm:$0xff]  ;;  %v357_v9 = vld [vmem:[%s1317_s4 + $0x10] sm:$0xff]  ;;  %vm447_vm1 = vcmask 64512   ;;  %v1116_v40 = vmov -inf   ;;  %v1117_v62 = vmov 0.0  }
  0x16   : > { %323 = vperm.xlu1 %1013, %v320_v0   ;;  %375 = vperm.xlu0 %1012, %v362_v2   ;;  %s947_s18 = sshll.u32 %s298_s15, 4  ;;  %v360_v7 = vld [vmem:[%s1318_s5] sm:$0xff]  ;;  %351 = vst [vmem:[#allocation3] sm:$0x1] %v1116_v40  ;;  %s812_s15 = sshll.u32 %s809_s13, 4  ;;  %s813_s15 = int_to_ptr.hbm [resolvable:$true] %s812_s15 }
  0x17   : > { %1014 = vset.pattern.permute.xlu2 %v1115_v1  ;;  %s312_s27 = scalar_lea.vmem %s1314_s1, %s947_s18  ;;  %s304_s19 = scalar_lea.vmem %s1313_s0, %s947_s18  ;;  %v317_v12 = vld [vmem:[%s1315_s2] sm:$0xff]  ;;  %352 = vst [vmem:[#allocation4] sm:$0x1] %v1117_v62 }
  0x18   : > { %370 = vperm.xlu2 %1014, %v361_v3   ;;  %v359_v4 = vld [vmem:[%s312_s27 + $0x8] sm:$0xff]  ;;  %v358_v5 = vld [vmem:[%s312_s27] sm:$0xff]  ;;  %s294_s18 = sand.u32 1, %s1097_s22   ;;  %s1049_s16 = sshra.s32 %s813_s15, 4  ;;  %s1050_s16 = int_to_ptr.hbm [resolvable:$true] %s1049_s16 }
  0x19   : > { %402 = vmatpush.msra.mxu3 %v359_v4  ;;  %v1242_v10 = vld [vmem:[%s304_s19 + $0x8] sm:$0xff]  ;;  %v1244_v11 = vld [vmem:[%s304_s19] sm:$0xff]  ;;  %s917_s28 = sshll.u32 %s294_s18, 4  ;;  %s797_s24 = scalar_lea.sflag [#allocation7], %s294_s18 }
  0x1a   : > { %344 = vmatpush.msra.mxu0 %v1242_v10  ;;  %s296_s8 = scalar_lea.vmem [#allocation6], %s917_s28  ;;  %s1051_s17 = scalar_lea.hbm %s1050_s16, 16 }
  0x1b   : > { %403 = vmatpush.msra.mxu3 %v358_v5  ;;  %s810_s14 = sshll.u32 %s296_s8, 4  ;;  %p1052_p12 = scmp.ne.s32.totalorder %s1050_s16, %s1051_s17  ;;  %s811_s14 = int_to_ptr.vmem [resolvable:$true] %s810_s14 }
  0x1c   : > { %923 = vmatmul.msk.f32.vlgmr.msra.gmra.mxu3 %vm326_vm0, %v355_v6  ;;  %345 = vmatpush.msra.mxu0 %v1244_v11  ;;  %s1055_s27 = scalar_lea.hbm %s1319_s6, 32  ;;  %p1056_p1 = scmp.lt.s32.totalorder %s1050_s16, %s1319_s6 }
  0x1d   : > { %922 = vmatmul.msk.f32.vlgmr.msra.gmra.mxu0 %vm326_vm0, %v317_v12  ;;  %p1053_p13 = pnand %p1052_p12, %p1195_p4  ;;  %p1057_p2 = scmp.lt.s32.totalorder %s1055_s27, %s1051_s17 }
  0x1e   : > { %365 = vperm.xlu1 %1013, %v360_v7  }
  0x1f   : > { %p1054_p0 = pneg %p1053_p13  ;;  %p1058_p3 = por %p1057_p2, %p1056_p1 }
  0x21   : > { %p1059_p5 = pnand %p1058_p3, %p1054_p0 }
  0x24   : > { %924 = vmatmul.msk.f32.gmra.mxu3 %vm326_vm0, %v356_v8 }
  0x2c   : > { %925 = vmatmul.msk.f32.gmra.mxu3 %vm326_vm0, %v357_v9 }
  0x88   : > { %v376_v15 = vpop.permute.xlu0 %375  ;;  %v324_v18 = vpop.permute.xlu1 %323 }
  0x9a   : > { %v347_v19 = vpop.f32.mrf.mxu0 }
  0x9b   : > { %v348_v20 = vadd.f32 %v347_v19, %v324_v18 }
  0x9d   : > { %511 = vmatpush.msrb.mxu0 %v348_v20  ;;  %950 = vmatpush.msra.mxu1 %v348_v20 }
  0x9e   : > { %951 = vmatpush.msra.mxu2 %v348_v20 }
  0x9f   : > { %v1252_v13 = vpop.f32.mrf.mxu3 }
  0xa7   : > { %v1254_v14 = vpop.f32.mrf.mxu3 }
  0xaf   : > { %v411_v16 = vpop.f32.mrf.mxu3 }
  0xb0   : > { %v412_v17 = vadd.f32 %v411_v16, %v376_v15  ;;  %v561_v15 = vld [vmem:[#allocation3] sm:$0x1] }
  0xb2   : > { %415 = vxpose.xlu0.b32.start.end [1/1] (short) %v412_v17, 128 }
 0x156   : > { %v431_v21 = vpop.trf.xlu0 }
 0x157   : > { %926 = vmatmul.msk.f32.vlgmr.msrb.gmra.mxu0 %vm447_vm1, %v431_v21 }
 0x15e   : > { %v432_v22 = vpop.trf.xlu0 }
 0x15f   : > { %927 = vmatmul.msk.f32.gmra.mxu0 %vm447_vm1, %v432_v22 }
 0x166   : > { %v433_v23 = vpop.trf.xlu0 }
 0x167   : > { %928 = vmatmul.msk.f32.gmra.mxu0 %vm447_vm1, %v433_v23 }
 0x16e   : > { %v434_v24 = vpop.trf.xlu0 }
 0x16f   : > { %929 = vmatmul.msk.f32.gmra.mxu0 %vm447_vm1, %v434_v24 }
 0x176   : > { %v435_v25 = vpop.trf.xlu0 }
 0x177   : > { %930 = vmatmul.msk.f32.gmra.mxu0 %vm447_vm1, %v435_v25 }
 0x17e   : > { %v436_v26 = vpop.trf.xlu0 }
 0x17f   : > { %931 = vmatmul.msk.f32.vlgmr.msra.gmra.mxu1 %vm447_vm1, %v436_v26 }
 0x186   : > { %v437_v27 = vpop.trf.xlu0 }
 0x187   : > { %932 = vmatmul.msk.f32.gmra.mxu1 %vm447_vm1, %v437_v27 }
 0x18e   : > { %v438_v28 = vpop.trf.xlu0 }
 0x18f   : > { %933 = vmatmul.msk.f32.gmra.mxu1 %vm447_vm1, %v438_v28 }
 0x196   : > { %v439_v29 = vpop.trf.xlu0 }
 0x197   : > { %934 = vmatmul.msk.f32.gmra.mxu1 %vm447_vm1, %v439_v29 }
 0x19e   : > { %v440_v30 = vpop.trf.xlu0 }
 0x19f   : > { %935 = vmatmul.msk.f32.gmra.mxu1 %vm447_vm1, %v440_v30 }
 0x1a6   : > { %v441_v31 = vpop.trf.xlu0 }
 0x1a7   : > { %936 = vmatmul.msk.f32.vlgmr.msra.gmra.mxu2 %vm447_vm1, %v441_v31 }
 0x1ae   : > { %v442_v32 = vpop.trf.xlu0 }
 0x1af   : > { %937 = vmatmul.msk.f32.gmra.mxu2 %vm447_vm1, %v442_v32 }
 0x1b6   : > { %v443_v33 = vpop.trf.xlu0 }
 0x1b7   : > { %938 = vmatmul.msk.f32.gmra.mxu2 %vm447_vm1, %v443_v33 }
 0x1be   : > { %v444_v34 = vpop.trf.xlu0 }
 0x1bf   : > { %939 = vmatmul.msk.f32.gmra.mxu2 %vm447_vm1, %v444_v34 }
 0x1c6   : > { %v445_v35 = vpop.trf.xlu0 }
 0x1c7   : > { %940 = vmatmul.msk.f32.gmra.mxu2 %vm447_vm1, %v445_v35 }
 0x1ce   : > { %v446_v36 = vpop.trf.xlu0 }
 0x1cf   : > { %941 = vmatmul.msk.f32.gmra.mxu2 %vm447_vm1, %v446_v36 }
 0x1d4   : > { %v513_v37 = vpop.f32.mrf.mxu0 }
 0x1dc   : > { %v516_v41 = vpop.f32.mrf.mxu0 }
 0x1e4   : > { %v519_v44 = vpop.f32.mrf.mxu0 }
 0x1ec   : > { %v522_v47 = vpop.f32.mrf.mxu0 }
 0x1f4   : > { %v525_v51 = vpop.f32.mrf.mxu0 }
 0x1f5   : > { %v562_v54 = vmax.f32 %v513_v37, %v525_v51 }
 0x1fc   : > { %v528_v38 = vpop.f32.mrf.mxu1 }
 0x1fd   : > { %v563_v53 = vmax.f32 %v516_v41, %v528_v38 }
 0x204   : > { %v531_v42 = vpop.f32.mrf.mxu1 }
 0x205   : > { %v564_v55 = vmax.f32 %v519_v44, %v531_v42 }
 0x20c   : > { %v534_v45 = vpop.f32.mrf.mxu1 }
 0x20d   : > { %v565_v56 = vmax.f32 %v522_v47, %v534_v45 }
 0x214   : > { %v537_v48 = vpop.f32.mrf.mxu1 }
 0x215   : > { %v566_v58 = vmax.f32 %v562_v54, %v537_v48 }
 0x21c   : > { %v540_v52 = vpop.f32.mrf.mxu1 }
 0x21d   : > { %v567_v57 = vmax.f32 %v563_v53, %v540_v52  ;;  %v371_v52 = vpop.permute.xlu2 %370 }
 0x22a   : > { %v543_v39 = vpop.f32.mrf.mxu2 }
 0x22b   : > { %v568_v59 = vmax.f32 %v564_v55, %v543_v39  ;;  %v409_v55 = vadd.f32 %v1254_v14, %v371_v52 }
 0x232   : > { %v546_v43 = vpop.f32.mrf.mxu2 }
 0x233   : > { %v569_v60 = vmax.f32 %v565_v56, %v546_v43 }
 0x23a   : > { %v549_v46 = vpop.f32.mrf.mxu2 }
 0x23b   : > { %v570_v0 = vmax.f32 %v566_v58, %v549_v46 }
 0x242   : > { %v552_v49 = vpop.f32.mrf.mxu2 }
 0x243   : > { %v571_v61 = vmax.f32 %v567_v57, %v552_v49 }
 0x245   : > { %v574_v3 = vmax.f32 %v570_v0, %v571_v61  ;;  %v705_v61 = vld [vmem:[#allocation4] sm:$0x1] }
 0x24a   : > { %v555_v50 = vpop.f32.mrf.mxu2 }
 0x24b   : > { %v572_v1 = vmax.f32 %v568_v59, %v555_v50 }
 0x252   : > { %v558_v63 = vpop.f32.mrf.mxu2 }
 0x253   : > { %v573_v2 = vmax.f32 %v569_v60, %v558_v63 }
 0x255   : > { %v575_v4 = vmax.f32 %v572_v1, %v573_v2 }
 0x257   : > { %v576_v5 = vmax.f32 %v574_v3, %v575_v4 }
 0x259   : > { %v577_v6 = vrot.slane %v576_v5, 4 }
 0x25b   : > { %v578_v7 = vmax.f32 %v576_v5, %v577_v6 }
 0x25d   : > { %v579_v8 = vrot.slane %v578_v7, 2 }
 0x25f   : > { %v580_v9 = vmax.f32 %v578_v7, %v579_v8 }
 0x261   : > { %v581_v12 = vrot.slane %v580_v9, 1 }
 0x263   : > { %v582_v16 = vmax.f32 %v580_v9, %v581_v12 }
 0x265   : > { %v583_v17 = vmax.f32 %v561_v15, %v582_v16 }
 0x267   : > { %v588_v18 = vperm.slane %v583_v17, 0  ;;  %764 = vst [vmem:[#allocation3] sm:$0x1] %v583_v17  ;;  %v584_v49 = vsub.f32 %v561_v15, %v583_v17 }
 0x269   : > { %v597_v19 = vsub.f32 %v534_v45, %v588_v18  ;;  %v596_v20 = vsub.f32 %v531_v42, %v588_v18  ;;  %v595_v21 = vsub.f32 %v528_v38, %v588_v18  ;;  %v594_v22 = vsub.f32 %v525_v51, %v588_v18  ;;  %v366_v45 = vpop.permute.xlu1 %365 }
 0x26a   : > { %v591_v25 = vsub.f32 %v516_v41, %v588_v18  ;;  %v590_v26 = vsub.f32 %v513_v37, %v588_v18  ;;  %v593_v28 = vsub.f32 %v522_v47, %v588_v18  ;;  %v592_v30 = vsub.f32 %v519_v44, %v588_v18 }
 0x26b   : > { %v620_v23 = vmul.f32 1.442695, %v597_v19  ;;  %v618_v24 = vmul.f32 1.442695, %v596_v20  ;;  %v616_v27 = vmul.f32 1.442695, %v595_v21  ;;  %v406_v47 = vadd.f32 %v1252_v13, %v366_v45 }
 0x26c   : > { %v614_v29 = vmul.f32 1.442695, %v594_v22  ;;  %v608_v31 = vmul.f32 1.442695, %v591_v25  ;;  %v606_v32 = vmul.f32 1.442695, %v590_v26 }
 0x26d   : > { %1015 = vpow2.f32 %v620_v23  ;;  %v612_v33 = vmul.f32 1.442695, %v593_v28  ;;  %v610_v34 = vmul.f32 1.442695, %v592_v30  ;;  %v585_v53 = vmul.f32 1.442695, %v584_v49 }
 0x26e   : > { %1017 = vpow2.f32 %v618_v24 }
 0x26f   : > { %1019 = vpow2.f32 %v616_v27 }
 0x270   : > { %1021 = vpow2.f32 %v614_v29 }
 0x271   : > { %1023 = vpow2.f32 %v608_v31 }
 0x272   : > { %1025 = vpow2.f32 %v606_v32 }
 0x273   : > { %v1016_v35 = vpop.eup %1015  ;;  %1027 = vpow2.f32 %v612_v33 }
 0x274   : > { %745 = vmatpush.msrb.mxu3 %v1016_v35  ;;  %v1018_v36 = vpop.eup %1017  ;;  %1029 = vpow2.f32 %v610_v34 }
 0x275   : > { %v1020_v37 = vpop.eup %1019  ;;  %1031 = vpow2.f32 %v585_v53 }
 0x276   : > { %746 = vmatpush.msrb.mxu3 %v1018_v36  ;;  %v1022_v38 = vpop.eup %1021 }
 0x277   : > { %v1024_v39 = vpop.eup %1023 }
 0x278   : > { %747 = vmatpush.msrb.mxu3 %v1020_v37  ;;  %v1026_v40 = vpop.eup %1025 }
 0x279   : > { %v1028_v41 = vpop.eup %1027  ;;  %v707_v42 = vadd.f32 %v1026_v40, %v1024_v39 }
 0x27a   : > { %748 = vmatpush.msrb.mxu3 %v1022_v38  ;;  %v1030_v43 = vpop.eup %1029 }
 0x27b   : > { %v708_v44 = vadd.f32 %v1030_v43, %v707_v42  ;;  %v1032_v60 = vpop.eup %1031 }
 0x27c   : > { %749 = vmatpush.msrb.mxu3 %v1028_v41  ;;  %v706_v62 = vmul.f32 %v1032_v60, %v705_v61  ;;  %v733_v8 = vperm.slane %v1032_v60, 0 }
 0x27d   : > { %v709_v46 = vadd.f32 %v1028_v41, %v708_v44 }
 0x27e   : > { %750 = vmatpush.msrb.mxu3 %v1030_v43  ;;  %v735_v16 = vmul.f32 0.0, %v733_v8 }
 0x27f   : > { %v710_v48 = vadd.f32 %v1022_v38, %v709_v46 }
 0x280   : > { %751 = vmatpush.msrb.mxu3 %v1024_v39 }
 0x281   : > { %v711_v50 = vadd.f32 %v1020_v37, %v710_v48 }
 0x282   : > { %752 = vmatpush.msrb.mxu3 %v1026_v40 }
 0x283   : > { %753 = vmatmul.f32.vlgmr.msrb.gmra.mxu3 %v406_v47  ;;  %v712_v51 = vadd.f32 %v1018_v36, %v711_v50 }
 0x285   : > { %v713_v54 = vadd.f32 %v1016_v35, %v712_v51 }
 0x287   : > { %v722_v56 = vrot.slane %v713_v54, 4 }
 0x289   : > { %v723_v57 = vadd.f32 %v722_v56, %v713_v54 }
 0x28b   : > { %756 = vmatmul.f32.gmra.mxu3 %v409_v55  ;;  %v724_v58 = vrot.slane %v723_v57, 2 }
 0x28d   : > { %v725_v59 = vadd.f32 %v724_v58, %v723_v57 }
 0x28f   : > { %v726_v13 = vrot.slane %v725_v59, 1 }
 0x291   : > { %v727_v63 = vadd.f32 %v726_v13, %v725_v59 }
 0x293   : > { %v728_v0 = vadd.f32 %v727_v63, %v706_v62 }
 0x295   : > { %729 = vst [vmem:[#allocation4] sm:$0x1] %v728_v0 }
 0x29c   : > { %v768_v1 = vld [vmem:[#allocation4] sm:$0x1] }
 0x29d   : > { %1033 = vrcp.f32 %v768_v1  ;;  %v780_v6 = vand.u32 2147483648, %v768_v1  ;;  %vm774_vm3 = vweird.f32 %v768_v1  ;;  %v778_v7 = vand.u32 2147483647, %v768_v1 }
 0x29f   : > { %v781_v12 = vor.u32 1.1754944e-38, %v780_v6  ;;  %vm779_vm5 = vcmp.eq.f32.partialorder %v778_v7, 8.507059e+37 }
 0x2a3   : > { %v1034_v2 = vpop.eup %1033 }
 0x2a4   : > { %v770_v3 = vmul.f32 %v1034_v2, %v768_v1  ;;  %vm775_vm2 = vweird.f32 %v1034_v2 }
 0x2a5   : > { %vm776_vm4 = vmor %vm774_vm3, %vm775_vm2 }
 0x2a6   : > { %v771_v4 = vsub.f32 1.0, %v770_v3 }
 0x2a8   : > { %v772_v14 = vmul.f32 %v1034_v2, %v771_v4 }
 0x2aa   : > { %v773_v5 = vadd.f32 %v1034_v2, %v772_v14 }
 0x2ac   : > { %v777_v9 = vsel %vm776_vm4, %v1034_v2, %v773_v5 }
 0x2ad   : > { %v782_v15 = vsel %vm779_vm5, %v781_v12, %v777_v9 }
 0x2ae   : > { %v786_v19 = vperm.slane %v782_v15, 0 }
 0x306   : > { %v754_v17 = vpop.f32.mrf.mxu3 }
 0x307   : > { %v760_v18 = vadd.f32 %v754_v17, %v735_v16 }
 0x309   : > { %v788_v20 = vmul.f32 %v786_v19, %v760_v18 }
 0x30b   : > { %v792_v21 = vadd.f32 %v788_v20, %v1244_v11 }
 0x30d   : > { %794 = vst [vmem:[%s296_s8] sm:$0xff] %v792_v21 }
 0x30e   : > { %v757_v22 = vpop.f32.mrf.mxu3 }
 0x30f   : > { %v761_v23 = vadd.f32 %v757_v22, %v735_v16 }
 0x311   : > { %v789_v24 = vmul.f32 %v786_v19, %v761_v23 }
 0x313   : > { %v793_v25 = vadd.f32 %v789_v24, %v1242_v10 }
 0x315   : > { %795 = vst [vmem:[%s296_s8 + $0x8] sm:$0xff] %v793_v25 }
 0x316   : > { %1062 = shalt.err (!%p1059_p5)
}
 0x317   : > { %s1118_s18 = smov 128   ;;  %s1119_s8 = smov 8  }
 0x318   : > { %952 = dma.vmem_to_hbm [thread:$0]  (%p1195_p4), %s811_s14, 256, %s813_s15, %s797_s24, %s1118_s18, %s1118_s18, %s1119_s8  }
 0x319 PF: > { %p958_p6 = scmp.ge.s32.totalorder %s1113_s26, 2  ;;  %s827_s11 = sand.u32 1, %s1093_s21  }
 0x31a   : > { %s828_s12 = scalar_lea.sflag [#allocation7], %s827_s11 }
 0x31b   : > { %p955_p7 = pnand %p958_p6, %p1202_p8 }
 0x31d   : > { %p956_p9 = pneg %p955_p7 }
 0x31f   : > { %1088 = dma.done.wait (%p956_p9), %s828_s12, 256  }
 0x320   : > { %1090 = vsyncadd (%p956_p9), %s828_s12, 4294967040  ;;  %s19_s26 = sadd.s32 1, %s1113_s26   ;;  %s1322_s21 = smov %s1097_s22 }
 0x321   : > { %p16_p10 = scmp.ge.s32.totalorder %s19_s26, 4   ;;  %s1323_s22 = smov %s1101_s23 }
 0x322   : > { %s1324_s23 = smov %s1208_s10  ;;  %s1325_s24 = smov %s1109_s25 }
 0x323   : > { %s1326_s25 = smov %s1328_s29  ;;  %18 = sbr.rel (!%p16_p10) target bundleno = 4 (0x4), region = 90 }
 0x328   :  { %834 = vsyncpa [#allocation7], 1 }
 0x329   :  { %836 = vsyncpa [#allocation7 + $0x1], 1 }

</bundles_post_ra>
